<compile_context>
chip_gen: v6e
topology: v6e:2x2x1
jax: 0.10.0
libtpu: 0.0.40
codegen_flags: <defaults>
</compile_context>

<pallas_src>
import math
import functools

import jax
import jax.numpy as jnp
from jax import lax
from jax.experimental import pallas as pl
from jax.experimental.pallas import tpu as pltpu


def _detect_tpu():
    """Generation-aware knobs: scoped-VMEM limit and bf16-EUP availability."""
    try:
        kind = jax.devices()[0].device_kind.lower()
    except Exception:
        kind = ""
    is_v7 = "v7" in kind
    bf16_eup = ("v6" in kind) or is_v7          # v6e/v7x EUP supports bf16 exp
    if is_v7:
        vmem = 48 * 1024 * 1024                 # v7x: 64 MiB physical VMEM
    elif ("v5" in kind) or ("v6" in kind):
        vmem = 96 * 1024 * 1024                 # 128 MiB physical
    else:
        vmem = 64 * 1024 * 1024
    return vmem, bf16_eup


VMEM_LIMIT_BYTES, _BF16_EUP = _detect_tpu()
_EXP_DTYPE = jnp.bfloat16 if _BF16_EUP else jnp.float32  # v5e has no bf16 EUP
NEG_INF = jnp.finfo(jnp.float32).min


# ---------------------------------------------------------------------------
# Tiled matmul (+bias) kernel: fused QKV projection and o_proj.
# ---------------------------------------------------------------------------

def _linear_kernel(x_ref, w_ref, b_ref, o_ref, acc_ref):
    k = pl.program_id(2)

    @pl.when(k == 0)
    def _():
        acc_ref[...] = jnp.zeros_like(acc_ref)

    acc_ref[...] += jnp.dot(x_ref[...], w_ref[...],
                            preferred_element_type=jnp.float32)

    @pl.when(k == pl.num_programs(2) - 1)
    def _():
        o_ref[...] = (acc_ref[...] + b_ref[...]).astype(o_ref.dtype)


def linear(x, w, b, *, out_dtype=jnp.bfloat16, tm=512, tn=256, tk=512):
    """y = x @ w + b, tiled over (M, N, K) with an f32 VMEM accumulator."""
    M, K = x.shape
    _, N = w.shape
    tm, tn, tk = min(tm, M), min(tn, N), min(tk, K)
    assert M % tm == 0 and N % tn == 0 and K % tk == 0
    grid = (M // tm, N // tn, K // tk)

    out_isz = jnp.dtype(out_dtype).itemsize
    cost = pl.CostEstimate(
        flops=2 * M * K * N,
        transcendentals=0,
        bytes_accessed=(M * K * x.dtype.itemsize + K * N * w.dtype.itemsize
                        + N * 4 + M * N * out_isz),
    )
    return pl.pallas_call(
        _linear_kernel,
        out_shape=jax.ShapeDtypeStruct((M, N), out_dtype),
        grid=grid,
        in_specs=[
            pl.BlockSpec((tm, tk), lambda i, j, k: (i, k)),
            pl.BlockSpec((tk, tn), lambda i, j, k: (k, j)),
            pl.BlockSpec((1, tn), lambda i, j, k: (0, j)),
        ],
        out_specs=pl.BlockSpec((tm, tn), lambda i, j, k: (i, j)),
        scratch_shapes=[pltpu.VMEM((tm, tn), jnp.float32)],
        compiler_params=pltpu.CompilerParams(
            dimension_semantics=("parallel", "parallel", "arbitrary"),
            vmem_limit_bytes=VMEM_LIMIT_BYTES,
        ),
        cost_estimate=cost,
    )(x, w, b.reshape(1, N))


# ---------------------------------------------------------------------------
# RoPE kernel: rotate a group of heads once (hoisted out of the attention
# kv loop).  The rotate_half sign pattern is pre-folded into the sin table and
# the 1/sqrt(D) softmax scale is folded into Q here (scale=1 for K).
# ---------------------------------------------------------------------------

def _rope_kernel(x_ref, cos_ref, sin_ref, o_ref, *, scale, half):
    x = x_ref[...].astype(jnp.float32)
    rot = x * cos_ref[...] + pltpu.roll(x, shift=half, axis=1) * sin_ref[...]
    o_ref[...] = (rot * scale).astype(o_ref.dtype)


def apply_rope(qkv, cos, sin_signed, *, head_offset, n_out_heads, head_dim,
               scale, ts=256):
    """Applies RoPE to heads [head_offset, head_offset+n_out_heads) of qkv.

    qkv:        [B, S, total_heads * D]  (bf16; q | k | v along features)
    cos:        [B, S, D]  (f32)
    sin_signed: [B, S, D]  (f32, rotate_half sign pre-folded)
    returns:    [B, S, n_out_heads * D]  bf16, rotated (and scaled by `scale`)
    """
    B, S, _ = qkv.shape
    D = head_dim
    ts = min(ts, S)
    assert S % ts == 0
    grid = (B, n_out_heads, S // ts)

    kernel = functools.partial(_rope_kernel, scale=scale, half=D // 2)
    return pl.pallas_call(
        kernel,
        out_shape=jax.ShapeDtypeStruct((B, S, n_out_heads * D), jnp.bfloat16),
        grid=grid,
        in_specs=[
            pl.BlockSpec((None, ts, D), lambda b, h, si: (b, si, head_offset + h)),
            pl.BlockSpec((None, ts, D), lambda b, h, si: (b, si, 0)),
            pl.BlockSpec((None, ts, D), lambda b, h, si: (b, si, 0)),
        ],
        out_specs=pl.BlockSpec((None, ts, D), lambda b, h, si: (b, si, h)),
        compiler_params=pltpu.CompilerParams(
            dimension_semantics=("parallel", "parallel", "parallel"),
            vmem_limit_bytes=VMEM_LIMIT_BYTES,
        ),
    )(qkv, cos, sin_signed)


# ---------------------------------------------------------------------------
# Flash-style causal attention kernel, GQA-batched over KV heads.
# ---------------------------------------------------------------------------

def _flash_attn_kernel(q_ref, k_ref, v_ref, o_ref, m_ref, l_ref, acc_ref,
                       *, n_rep, tq, tk, head_dim, exp_dtype):
    qi = pl.program_id(2)
    ki = pl.program_id(3)
    D = head_dim
    q_start = qi * tq
    k_start = ki * tk

    @pl.when(ki == 0)
    def _():
        m_ref[...] = jnp.full_like(m_ref, -jnp.inf)
        l_ref[...] = jnp.zeros_like(l_ref)
        acc_ref[...] = jnp.zeros_like(acc_ref)

    def process(masked):
        k = k_ref[...]                          # (tk, D) bf16, pre-rotated
        v = v_ref[...]                          # (tk, D) bf16
        if masked:
            q_pos = q_start + lax.broadcasted_iota(jnp.int32, (tq, tk), 0)
            k_pos = k_start + lax.broadcasted_iota(jnp.int32, (tq, tk), 1)
            keep = k_pos <= q_pos
        for h in range(n_rep):                  # static unroll over GQA group
            # Pre-rotated, pre-scaled Q for query head (g*n_rep + h).
            q_h = q_ref[:, h * D:(h + 1) * D]   # (tq, D) bf16
            s = lax.dot_general(
                q_h, k, (((1,), (1,)), ((), ())),
                preferred_element_type=jnp.float32)          # (tq, tk)
            if masked:
                s = jnp.where(keep, s, NEG_INF)
            m_prev = m_ref[h]                                  # (tq, 1)
            m_new = jnp.maximum(m_prev, jnp.max(s, axis=-1, keepdims=True))
            alpha = jnp.exp(m_prev - m_new)
            # bf16 exp on v6e/v7x (bf16 EUP), f32 elsewhere.
            p = jnp.exp((s - m_new).astype(exp_dtype))
            l_ref[h] = alpha * l_ref[h] + jnp.sum(
                p.astype(jnp.float32), axis=-1, keepdims=True)
            acc_ref[h] = alpha * acc_ref[h] + lax.dot_general(
                p.astype(jnp.bfloat16), v, (((1,), (0,)), ((), ())),
                preferred_element_type=jnp.float32)
            m_ref[h] = m_new

    # Interior tile (fully below the diagonal): unmasked fast path.
    @pl.when(k_start + tk - 1 <= q_start)
    def _():
        process(masked=False)

    # Diagonal-straddling tile: build & apply the causal mask in-kernel.
    @pl.when(jnp.logical_and(k_start <= q_start + tq - 1,
                             k_start + tk - 1 > q_start))
    def _():
        process(masked=True)

    # Fully-masked tiles (k_start > q_start + tq - 1) fall through: their K/V
    # DMAs are elided by the clamped index_map, and no compute runs.

    @pl.when(ki == pl.num_programs(3) - 1)
    def _():
        for h in range(n_rep):
            inv_l = pl.reciprocal(l_ref[h], approx=True)   # EUP slot
            o_ref[:, h * D:(h + 1) * D] = (acc_ref[h] * inv_l).astype(o_ref.dtype)


def flash_attention(q_rot, k_rot, qkv, *, num_heads, num_kv_heads, head_dim,
                    tq=256, tk=256):
    """Causal GQA attention, batched over KV heads.

    q_rot: [B, S, nH * D]   bf16, RoPE'd and scaled by 1/sqrt(D)
    k_rot: [B, S, nKV * D]  bf16, RoPE'd
    qkv:   [B, S, (nH + 2*nKV) * D]  bf16 (only the V part is read here)
    returns: [B, S, nH * D] bf16
    """
    B, S, _ = q_rot.shape
    D = head_dim
    n_rep = num_heads // num_kv_heads
    assert D % 128 == 0, "head_dim must be a multiple of 128 (lane width)"
    tq, tk = min(tq, S), min(tk, S)
    assert S % tq == 0 and S % tk == 0
    assert tk <= tq, "tk > tq untested for the causal online-softmax path"
    grid = (B, num_kv_heads, S // tq, S // tk)

    v_off = num_heads + num_kv_heads   # V block offset (in D units) inside qkv

    def kv_block(qi, ki):
        # Clamp skipped (fully-masked) steps to the last valid kv tile so the
        # requested block does not change and Pallas elides the DMA.
        return jnp.minimum(ki, (qi * tq + tq - 1) // tk)

    kernel = functools.partial(_flash_attn_kernel, n_rep=n_rep, tq=tq, tk=tk,
                               head_dim=D, exp_dtype=_EXP_DTYPE)

    # Causal-aware estimate (~half of the dense 4*B*nH*S*S*D).
    cost = pl.CostEstimate(
        flops=2 * B * num_heads * S * S * D,
        transcendentals=B * num_heads * S * S // 2,
        bytes_accessed=2 * B * S * D * (2 * num_heads + 2 * num_kv_heads),
    )

    return pl.pallas_call(
        kernel,
        out_shape=jax.ShapeDtypeStruct((B, S, num_heads * D), jnp.bfloat16),
        grid=grid,
        in_specs=[
            # Q: the n_rep query heads sharing KV head g (contiguous columns);
            # index does not depend on ki, so Q is DMA'd once per (b, g, qi).
            pl.BlockSpec((None, tq, n_rep * D),
                         lambda b, g, qi, ki: (b, qi, g)),
            # K / V tiles for KV head g, clamped to skip masked-tile DMAs.
            pl.BlockSpec((None, tk, D),
                         lambda b, g, qi, ki: (b, kv_block(qi, ki), g)),
            pl.BlockSpec((None, tk, D),
                         lambda b, g, qi, ki: (b, kv_block(qi, ki), v_off + g)),
        ],
        out_specs=pl.BlockSpec((None, tq, n_rep * D),
                               lambda b, g, qi, ki: (b, qi, g)),
        scratch_shapes=[
            pltpu.VMEM((n_rep, tq, 1), jnp.float32),   # m (running max)
            pltpu.VMEM((n_rep, tq, 1), jnp.float32),   # l (running denom)
            pltpu.VMEM((n_rep, tq, D), jnp.float32),   # acc
        ],
        compiler_params=pltpu.CompilerParams(
            dimension_semantics=("parallel", "parallel", "parallel", "arbitrary"),
            vmem_limit_bytes=VMEM_LIMIT_BYTES,
        ),
        cost_estimate=cost,
    )(q_rot, k_rot, qkv)


# ---------------------------------------------------------------------------
# Qwen2Attention module (parameters + forward glue)
# ---------------------------------------------------------------------------

class Qwen2AttentionPallas:
    def __init__(self, hidden_size, num_heads, num_kv_heads, rope_theta, key):
        assert hidden_size % num_heads == 0
        self.hidden_size = hidden_size
        self.num_heads = num_heads
        self.num_kv_heads = num_kv_heads
        self.head_dim = hidden_size // num_heads
        self.n_rep = num_heads // num_kv_heads
        self.rope_theta = rope_theta

        ks = jax.random.split(key, 7)
        s = 0.02
        H, D = hidden_size, self.head_dim
        # Weights stored as [in, out] so projections are x @ w (+ b).
        self.q_w = s * jax.random.normal(ks[0], (H, num_heads * D), jnp.float32)
        self.q_b = s * jax.random.normal(ks[1], (num_heads * D,), jnp.float32)
        self.k_w = s * jax.random.normal(ks[2], (H, num_kv_heads * D), jnp.float32)
        self.k_b = s * jax.random.normal(ks[3], (num_kv_heads * D,), jnp.float32)
        self.v_w = s * jax.random.normal(ks[4], (H, num_kv_heads * D), jnp.float32)
        self.v_b = s * jax.random.normal(ks[5], (num_kv_heads * D,), jnp.float32)
        self.o_w = s * jax.random.normal(ks[6], (num_heads * D, H), jnp.float32)
        self.o_b = jnp.zeros((H,), jnp.float32)  # o_proj has bias=False

        # Fused QKV weights (single projection pass); bf16 MXU inputs.
        self.w_qkv_bf16 = jnp.concatenate(
            [self.q_w, self.k_w, self.v_w], axis=1).astype(jnp.bfloat16)
        self.b_qkv = jnp.concatenate([self.q_b, self.k_b, self.v_b])
        self.o_w_bf16 = self.o_w.astype(jnp.bfloat16)

        # RoPE sign pattern [-1]*D/2 ++ [+1]*D/2 folded into the sin table.
        self._rope_sign = jnp.concatenate(
            [-jnp.ones((D // 2,), jnp.float32), jnp.ones((D // 2,), jnp.float32)])

    def rope_cos_sin(self, position_ids):
        """Default Qwen2RotaryEmbedding (attention_scaling = 1.0)."""
        D = self.head_dim
        inv_freq = 1.0 / (
            self.rope_theta ** (jnp.arange(0, D, 2, dtype=jnp.float32) / D))
        freqs = position_ids.astype(jnp.float32)[..., None] * inv_freq[None, None, :]
        emb = jnp.concatenate([freqs, freqs], axis=-1)  # [B, S, D]
        return jnp.cos(emb), jnp.sin(emb)

    def __call__(self, hidden_states, position_ids):
        B, S, H = hidden_states.shape
        nH, nKV, D = self.num_heads, self.num_kv_heads, self.head_dim

        # Fused QKV projection: one tiled matmul, bf16 output.
        x2d = hidden_states.reshape(B * S, H).astype(jnp.bfloat16)
        qkv = linear(x2d, self.w_qkv_bf16, self.b_qkv)        # [B*S, (nH+2nKV)*D]
        qkv = qkv.reshape(B, S, (nH + 2 * nKV) * D)           # free reshape

        cos, sin = self.rope_cos_sin(position_ids)
        sin_signed = sin * self._rope_sign                    # fold rotate_half sign

        # RoPE hoisted out of the attention kv loop; 1/sqrt(D) folded into Q.
        scale = 1.0 / math.sqrt(D)
        q_rot = apply_rope(qkv, cos, sin_signed, head_offset=0,
                           n_out_heads=nH, head_dim=D, scale=scale)
        k_rot = apply_rope(qkv, cos, sin_signed, head_offset=nH,
                           n_out_heads=nKV, head_dim=D, scale=1.0)

        # Flash attention: GQA-batched over KV heads, in-kernel causal mask,
        # output lands directly in [B, S, nH*D] bf16 (no transposes).
        attn = flash_attention(q_rot, k_rot, qkv,
                               num_heads=nH, num_kv_heads=nKV, head_dim=D)

        out = linear(attn.reshape(B * S, nH * D), self.o_w_bf16, self.o_b,
                     out_dtype=jnp.float32)
        return out.reshape(B, S, H)


# ---------------------------------------------------------------------------
# Pure-JAX f32 reference (mirrors the PyTorch forward) for correctness checking
# ---------------------------------------------------------------------------

def reference_forward(mod: Qwen2AttentionPallas, hidden_states, position_ids):
    B, S, H = hidden_states.shape
    nH, nKV, D = mod.num_heads, mod.num_kv_heads, mod.head_dim
    x2d = hidden_states.reshape(B * S, H)
    q = (x2d @ mod.q_w + mod.q_b).reshape(B, S, nH, D).transpose(0, 2, 1, 3)
    k = (x2d @ mod.k_w + mod.k_b).reshape(B, S, nKV, D).transpose(0, 2, 1, 3)
    v = (x2d @ mod.v_w + mod.v_b).reshape(B, S, nKV, D).transpose(0, 2, 1, 3)

    cos, sin = mod.rope_cos_sin(position_ids)
    cos_ = cos[:, None, :, :]
    sin_ = sin[:, None, :, :]

    def rotate_half(x):
        x1, x2 = x[..., : D // 2], x[..., D // 2:]
        return jnp.concatenate([-x2, x1], axis=-1)

    q = q * cos_ + rotate_half(q) * sin_
    k = k * cos_ + rotate_half(k) * sin_

    k = jnp.repeat(k, mod.n_rep, axis=1)
    v = jnp.repeat(v, mod.n_rep, axis=1)

    scores = jnp.einsum("bhqd,bhkd->bhqk", q, k) / math.sqrt(D)
    neg = jnp.finfo(jnp.float32).min
    i = jnp.arange(S)[:, None]
    j = jnp.arange(S)[None, :]
    mask = jnp.where(j <= i, 0.0, neg).astype(jnp.float32)
    scores = scores + mask[None, None]
    w = jax.nn.softmax(scores.astype(jnp.float32), axis=-1)
    attn = jnp.einsum("bhqk,bhkd->bhqd", w, v)
    attn = attn.transpose(0, 2, 1, 3).reshape(B * S, nH * D)
    return (attn @ mod.o_w).reshape(B, S, H)


# ---------------------------------------------------------------------------

if __name__ == "__main__":
    # Small Qwen2-like config: hidden=512, 4 query heads, 2 KV heads, head_dim=128
    B, S = 2, 8
    NUM_HEADS, NUM_KV_HEADS, HEAD_DIM = 4, 2, 128
    H = NUM_HEADS * HEAD_DIM
    ROPE_THETA = 10000.0

    key = jax.random.PRNGKey(0)
    k_param, k_x = jax.random.split(key)

    module = Qwen2AttentionPallas(H, NUM_HEADS, NUM_KV_HEADS, ROPE_THETA, k_param)

    hidden_states = jax.random.normal(k_x, (B, S, H), jnp.float32)
    position_ids = jnp.broadcast_to(jnp.arange(S, dtype=jnp.int32)[None, :], (B, S))

    out = module(hidden_states, position_ids)
    out = jax.block_until_ready(out)

    ref = reference_forward(module, hidden_states, position_ids)
    assert out.shape == (B, S, H)
    # bf16 intermediates + approx reciprocal -> loosened tolerance vs f32 ref.
    assert jnp.allclose(out, ref, atol=2e-2, rtol=2e-2), (
        "mismatch vs reference: max abs err = "
        f"{float(jnp.max(jnp.abs(out - ref)))}"
    )

    print("KERNEL_OK")
</pallas_src>

<mosaic_0001>
module attributes {stable_mosaic.version = 11 : i64} {
  func.func @_linear_kernel(%arg0: i32, %arg1: i32, %arg2: i32, %arg3: memref<16x512xbf16, #tpu.memory_space<vmem>>, %arg4: memref<512x256xbf16, #tpu.memory_space<vmem>>, %arg5: memref<1x256xf32, #tpu.memory_space<vmem>>, %arg6: memref<16x256xbf16, #tpu.memory_space<vmem>>, %arg7: memref<16x256xf32, #tpu.memory_space<vmem>>) attributes {dimension_semantics = [#tpu.dimension_semantics<parallel>, #tpu.dimension_semantics<parallel>, #tpu.dimension_semantics<arbitrary>], iteration_bounds = array<i64: 1, 4, 1>, scalar_prefetch = 0 : i64, scratch_operands = 1 : i64, tpu.core_type = #tpu.core_type<tc>, window_params = [{transform_indices = @transform_0, window_bounds = array<i64: 16, 512>}, {transform_indices = @transform_1, window_bounds = array<i64: 512, 256>}, {transform_indices = @transform_2, window_bounds = array<i64: 1, 256>}, {transform_indices = @transform_3, window_bounds = array<i64: 16, 256>}]} {
    %c0_i32 = arith.constant 0 : i32
    %0 = arith.cmpi eq, %arg2, %c0_i32 : i32
    %1 = arith.extui %0 : i1 to i32
    %c0_i32_0 = arith.constant 0 : i32
    %2 = arith.cmpi ne, %1, %c0_i32_0 : i32
    scf.if %2 {
      %cst_10 = arith.constant 0.000000e+00 : f32
      %12 = vector.broadcast %cst_10 : f32 to vector<16x256xf32>
      %c0_11 = arith.constant 0 : index
      %c0_12 = arith.constant 0 : index
      %13 = vector.load %arg7[%c0_11, %c0_12] : memref<16x256xf32, #tpu.memory_space<vmem>>, vector<16x256xf32>
      tpu.vector_store %arg7[%c0_11, %c0_12], %12 {strides = array<i32>} : memref<16x256xf32, #tpu.memory_space<vmem>>, vector<16x256xf32>,
    } else {
    }
    %c0 = arith.constant 0 : index
    %c0_1 = arith.constant 0 : index
    %3 = vector.load %arg7[%c0, %c0_1] : memref<16x256xf32, #tpu.memory_space<vmem>>, vector<16x256xf32>
    %c0_2 = arith.constant 0 : index
    %c0_3 = arith.constant 0 : index
    %4 = vector.load %arg3[%c0_2, %c0_3] : memref<16x512xbf16, #tpu.memory_space<vmem>>, vector<16x512xbf16>
    %c0_4 = arith.constant 0 : index
    %c0_5 = arith.constant 0 : index
    %5 = vector.load %arg4[%c0_4, %c0_5] : memref<512x256xbf16, #tpu.memory_space<vmem>>, vector<512x256xbf16>
    %cst = arith.constant dense<0.000000e+00> : vector<16x256xf32>
    %6 = tpu.matmul %4, %5, %cst {dimension_numbers = #tpu.dot_dimension_numbers<[1], [0], [0], [1], [0, 0, 1, 1], [], []>} : vector<16x512xbf16>, vector<512x256xbf16>, vector<16x256xf32> -> vector<16x256xf32>
    %7 = arith.addf %3, %6 : vector<16x256xf32>
    %c0_6 = arith.constant 0 : index
    %c0_7 = arith.constant 0 : index
    %8 = vector.load %arg7[%c0_6, %c0_7] : memref<16x256xf32, #tpu.memory_space<vmem>>, vector<16x256xf32>
    tpu.vector_store %arg7[%c0_6, %c0_7], %7 {strides = array<i32>} : memref<16x256xf32, #tpu.memory_space<vmem>>, vector<16x256xf32>,
    %c0_i32_8 = arith.constant 0 : i32
    %9 = arith.cmpi eq, %arg2, %c0_i32_8 : i32
    %10 = arith.extui %9 : i1 to i32
    %c0_i32_9 = arith.constant 0 : i32
    %11 = arith.cmpi ne, %10, %c0_i32_9 : i32
    scf.if %11 {
      %c0_10 = arith.constant 0 : index
      %c0_11 = arith.constant 0 : index
      %12 = vector.load %arg7[%c0_10, %c0_11] : memref<16x256xf32, #tpu.memory_space<vmem>>, vector<16x256xf32>
      %c0_12 = arith.constant 0 : index
      %c0_13 = arith.constant 0 : index
      %13 = vector.load %arg5[%c0_12, %c0_13] : memref<1x256xf32, #tpu.memory_space<vmem>>, vector<1x256xf32>
      %14 = vector.broadcast %13 : vector<1x256xf32> to vector<16x256xf32>
      %15 = arith.addf %12, %14 : vector<16x256xf32>
      %16 = arith.truncf %15 : vector<16x256xf32> to vector<16x256xbf16>
      %c0_14 = arith.constant 0 : index
      %c0_15 = arith.constant 0 : index
      %17 = vector.load %arg6[%c0_14, %c0_15] : memref<16x256xbf16, #tpu.memory_space<vmem>>, vector<16x256xbf16>
      tpu.vector_store %arg6[%c0_14, %c0_15], %16 {strides = array<i32>} : memref<16x256xbf16, #tpu.memory_space<vmem>>, vector<16x256xbf16>,
    } else {
    }
    return
  }
  func.func @transform_0(%arg0: i32, %arg1: i32, %arg2: i32) -> (i32, i32) {
    %c0_i32 = arith.constant 0 : i32
    return %arg0, %arg2 : i32, i32
  }
  func.func @transform_1(%arg0: i32, %arg1: i32, %arg2: i32) -> (i32, i32) {
    %c0_i32 = arith.constant 0 : i32
    return %arg2, %arg1 : i32, i32
  }
  func.func @transform_2(%arg0: i32, %arg1: i32, %arg2: i32) -> (i32, i32) {
    %c0_i32 = arith.constant 0 : i32
    %c0_i32_0 = arith.constant 0 : i32
    return %c0_i32, %arg1 : i32, i32
  }
  func.func @transform_3(%arg0: i32, %arg1: i32, %arg2: i32) -> (i32, i32) {
    %c0_i32 = arith.constant 0 : i32
    return %arg0, %arg1 : i32, i32
  }
}

</mosaic_0001>

<bundles_post_ra>
// kernel: tpu_custom_call.1
= control target key start
LH: loop header
LB: loop body
LE: loop exit
PB: predicated region body
PF: predicated region fallthrough
CT: control target
= control target key end

     0   :  { %8 = vsyncpa [#allocation4], 0  ;;  %s1729_s0 = inlined_call_operand.hbm [shape: bf16[16,512], index: 0, kind: input, shape index: {}]   ;;  %s1730_s1 = inlined_call_operand.hbm [shape: bf16[512,1024], index: 1, kind: input, shape index: {}]   ;;  %s1731_s2 = inlined_call_operand.hbm [shape: f32[1,1024], index: 2, kind: input, shape index: {}]   ;;  %s1732_s3 = inlined_call_operand.hbm [shape: bf16[16,1024], index: 3, kind: output, shape index: {}]  }
   0x1   :  { %9 = vsyncpa [#allocation7], 0 }
   0x2   :  { %11 = vsyncpa [#allocation7 + $0x1], 0 }
   0x3   :  { %12 = vsyncpa [#allocation5], 0 }
   0x4   :  { %14 = vsyncpa [#allocation5 + $0x1], 0  ;;  %s1464_s12 = smov 0   ;;  %s1466_s13 = smov 0  }
   0x5   :  { %s1468_s14 = smov 0   ;;  %s1470_s15 = smov 0  }
   0x6   :  { %s1472_s16 = smov 0   ;;  %s1474_s17 = smov 0  }
   0x7 LB: > { %s35_s18 = sadd.s32 1, %s1426_s16  ;;  %s76_s19 = sadd.s32 1, %s1418_s14  ;;  %s1430_s17 = sphi %s1474_s17, %s20_s17   ;;  %s1426_s16 = sphi %s1472_s16, %s1751_s16   ;;  %s1422_s15 = sphi %s1470_s15, %s1750_s15   ;;  %s1418_s14 = sphi %s1468_s14, %s1749_s14   ;;  %s1414_s13 = sphi %s1466_s13, %s1748_s13   ;;  %s1410_s12 = sphi %s1464_s12, %s1747_s12  }
   0x8   : > { %p37_p0 = scmp.ge.s32.totalorder %s35_s18, 4  ;;  %p83_p1 = scmp.ne.s32.totalorder %s1418_s14, %s1414_s13 }
   0x9   : > { %p84_p2 = scmp.eq.s32.totalorder %s1430_s17, 0  ;;  %p1102_p4 = scmp.lt.s32.totalorder %s1430_s17, 4 }
   0xa   : > { %s1753_s18 = smov (%p37_p0, %s35_s18), 0  ;;  %s186_s21 = sand.u32 1, %s1430_s17  }
   0xb   : > { %p85_p3 = por %p84_p2, %p83_p1  ;;  %s72_s20 = ssub.s32 %s1426_s16, %s1753_s18 }
   0xc   : > { %p74_p5 = scmp.eq.s32.totalorder %s72_s20, 0  ;;  %s188_s22 = sand.u32 1, %s1418_s14  }
   0xd   : > { %s1071_s23 = sshll.u32 %s1426_s16, 7  ;;  %s985_s25 = sshll.u32 %s188_s22, 9 }
   0xe   : > { %s1511_s24 = scalar_select %p74_p5, %s1418_s14, %s76_s19  }
   0xf   : > { %s199_s28 = scalar_lea.hbm %s1730_s1, %s1071_s23  ;;  %p1518_p6 = pnand %p1102_p4, %p85_p3 }
  0x10   : > { %s190_s30 = scalar_lea.vmem [#allocation6], %s985_s25  ;;  %s1522_s5 = scalar_lea.sflag [#allocation7], %s186_s21 }
  0x11   : > { %s200_s4 = sshll.u32 %s190_s30, 4  ;;  %p1734_p7 = pneg %p1518_p6  ;;  %s201_s4 = int_to_ptr.vmem [resolvable:$true] %s200_s4 }
  0x12   : > { %s1277_s6 = scalar_lea.vmem %s201_s4, 8192  ;;  %s1432_s7 = smov [#allocation6]  }
  0x13   : > { %p1278_p8 = scmp.ne.s32.totalorder %s201_s4, %s1277_s6  ;;  %s1282_s8 = sshll.u32 %s1432_s7, 4  ;;  %s1283_s8 = int_to_ptr.vmem [resolvable:$false] %s1282_s8 }
  0x14   : > { %s1284_s9 = scalar_lea.vmem %s1283_s8, 16384  ;;  %p1285_p11 = scmp.lt.s32.totalorder %s201_s4, %s1283_s8 }
  0x15   : > { %p1280_p9 = pnand %p1278_p8, %p1734_p7  ;;  %p1286_p12 = scmp.lt.s32.totalorder %s1284_s9, %s1277_s6 }
  0x17   : > { %p1281_p10 = pneg %p1280_p9  ;;  %p1287_p13 = por %p1286_p12, %p1285_p11 }
  0x19   : > { %p1288_p0 = pnand %p1287_p13, %p1281_p10 }
  0x1b   : > { %1291 = shalt.err (!%p1288_p0)
}
  0x1c   : > { %s1433_s10 = smov 512   ;;  %s1434_s11 = smov 128  }
  0x1d   : > { %s1435_s19 = smov 8   ;;  %s1533_s20 = sadd.s32 4294967295, %s1430_s17  }
  0x1e   : > { %1093 = dma.hbm_to_vmem [thread:$0]  (!%p1518_p6), %s199_s28, 8192, %s201_s4, %s1522_s5, %s1433_s10, %s1434_s11, %s1435_s19  }
  0x1f   : > { %s981_s21 = sadd.s32 4294967294, %s1430_s17   ;;  %p89_p2 = scmp.ne.s32.totalorder %s1414_s13, %s1410_s12 }
  0x20   : > { %p1733_p3 = scmp.eq.s32.totalorder %s1533_s20, 0  ;;  %p141_p4 = scmp.eq.s32.totalorder %s1533_s20, 3 }
  0x21   : > { %p147_p5 = scmp.eq.s32.totalorder %s981_s21, 3  ;;  %p982_p9 = scmp.ge.s32.totalorder %s1430_s17, 1 }
  0x22   : > { %p1542_p8 = por %p1733_p3, %p89_p2  ;;  %p1550_p10 = por %p141_p4, %p83_p1 }
  0x23   : > { %p1554_p11 = por %p147_p5, %p89_p2  ;;  %p154_p12 = scmp.lt.s32.totalorder %s1430_s17, 5 }
  0x24   : > { %s1738_s25 = scalar_select %p1550_p10, 1, 0 }
  0x25   : > { %s1739_s26 = scalar_select %p1554_p11, 1, 0 }
  0x26   : > { %p1559_p13 = pnand %p982_p9, %p154_p12  ;;  %s1436_s28 = smov [#allocation3]  }
  0x27   : > { %s172_s30 = sshll.u32 %s1436_s28, 4  ;;  %s988_s4 = sshll.u32 %s188_s22, 1  ;;  %s173_s30 = int_to_ptr.vmem [resolvable:$true] %s172_s30 }
  0x28   : > { %p1086_p0 = pneg %p1559_p13  ;;  %s1072_s6 = sshll.u32 %s1426_s16, 5 }
  0x29   : > { %s1577_s10 = scalar_lea.hbm %s1731_s2, %s1072_s6  ;;  %s214_s11 = scalar_lea.vmem [#allocation8], %s988_s4 }
  0x2a   : > { %p1570_p1 = pnand %p1086_p0, %p1733_p3  ;;  %s222_s19 = sshll.u32 %s214_s11, 4  ;;  %s223_s19 = int_to_ptr.vmem [resolvable:$true] %s222_s19 }
  0x2b   : > { %s1303_s21 = scalar_lea.vmem %s173_s30, 512  ;;  %p1311_p12 = scmp.lt.s32.totalorder %s173_s30, %s173_s30 }
  0x2c   : > { %p1294_p2 = pneg %p1570_p1  ;;  %p1304_p4 = scmp.ne.s32.totalorder %s173_s30, %s1303_s21 }
  0x2d   : > { %p1312_p0 = scmp.lt.s32.totalorder %s1303_s21, %s1303_s21 }
  0x2e   : > { %p1306_p5 = pnand %p1304_p4, %p1294_p2 }
  0x2f   : > { %p1313_p3 = por %p1312_p0, %p1311_p12 }
  0x30   : > { %p1307_p9 = pneg %p1306_p5 }
  0x32   : > { %p1314_p7 = pnand %p1313_p3, %p1307_p9 }
  0x34   : > { %1317 = shalt.err (!%p1314_p7)
}
  0x35   : > { %s1437_s22 = smov 256   ;;  %s1438_s28 = smov 16  }
  0x36   : > { %1089 = dma.hbm_to_vmem [thread:$0]  (!%p1570_p1), %s1729_s0, 512, %s173_s30, [#allocation4], %s1437_s22, %s1437_s22, %s1438_s28  }
  0x37   : > { %s1331_s8 = scalar_lea.vmem %s223_s19, 32  ;;  %p1742_p10 = pneg %p1518_p6 }
  0x38   : > { %p1332_p11 = scmp.ne.s32.totalorder %s223_s19, %s1331_s8  ;;  %s1439_s9 = smov [#allocation8]  }
  0x39   : > { %s1336_s11 = sshll.u32 %s1439_s9, 4  ;;  %s1337_s11 = int_to_ptr.vmem [resolvable:$false] %s1336_s11 }
  0x3a   : > { %p1334_p2 = pnand %p1332_p11, %p1742_p10  ;;  %s1338_s21 = scalar_lea.vmem %s1337_s11, 64 }
  0x3b   : > { %p1339_p7 = scmp.lt.s32.totalorder %s223_s19, %s1337_s11  ;;  %p1340_p3 = scmp.lt.s32.totalorder %s1338_s21, %s1331_s8 }
  0x3c   : > { %p1335_p4 = pneg %p1334_p2 }
  0x3d   : > { %p1341_p5 = por %p1340_p3, %p1339_p7 }
  0x3f   : > { %p1342_p9 = pnand %p1341_p5, %p1335_p4 }
  0x41   : > { %1345 = shalt.err (!%p1342_p9)
}
  0x42   : > { %1096 = dma.hbm_to_vmem [thread:$0]  (!%p1518_p6), %s1577_s10, 32, %s223_s19, %s1522_s5  }
  0x43   : > { %231 = sbr.rel (%p1559_p13) target bundleno = 363 (0x16b), region = 32  ;;  %p1743_p10 = scmp.eq.s32.totalorder (!%p1559_p13), %s1533_s20, 0 }
  0x48   : > { %1397 = dma.done.wait (%p1743_p10), [#allocation4], 512   ;;  %p1744_p11 = pmov %p1743_p10 }
  0x49   : > { %s237_s30 = sand.u32 1, %s1533_s20   ;;  %s1601_s7 = sand.u32 1, %s1414_s13  }
  0x4a   : > { %1399 = vsyncadd (%p1744_p11), [#allocation4], 4294966784  ;;  %s993_s29 = sshll.u32 %s1601_s7, 9  ;;  %s238_s22 = scalar_lea.sflag [#allocation7], %s237_s30 }
  0x4b   : > { %s1604_s28 = scalar_lea.vmem [#allocation6], %s993_s29 }
  0x4c   : > { %1401 = dma.done.wait (%p1542_p8), %s238_s22, 8224  }
  0x4d   : > { %1403 = vsyncadd (%p1542_p8), %s238_s22, 4294959072  ;;  %v1162_v0 = vld [vmem:[%s1604_s28 + $0x74] ss:$8 sps:$4 sm:$0xff]   ;;  %v1166_v2 = vld [vmem:[%s1604_s28 + $0x70] ss:$8 sps:$4 sm:$0xff]   ;;  %s994_s5 = sshll.u32 %s1601_s7, 1 }
  0x4e   : > { %v1164_v1 = vld [vmem:[%s1604_s28 + $0x174] ss:$8 sps:$4 sm:$0xff]   ;;  %705 = vmatprep.subr.bf16.mxu0 %v1162_v0  ;;  %v1167_v3 = vld [vmem:[%s1604_s28 + $0x170] ss:$8 sps:$4 sm:$0xff]   ;;  %v1168_v4 = vld [vmem:[%s1604_s28 + $0x64] ss:$8 sps:$4 sm:$0xff]  }
  0x4f   : > { %748 = vmatprep.subr.bf16.mxu1 %v1164_v1  ;;  %706 = vmatpush1.bf16.msra.mxu0 %v1166_v2  ;;  %v1170_v5 = vld [vmem:[%s1604_s28 + $0x164] ss:$8 sps:$4 sm:$0xff]   ;;  %v1172_v6 = vld [vmem:[%s1604_s28 + $0x60] ss:$8 sps:$4 sm:$0xff]   ;;  %v1174_v8 = vld [vmem:[%s1604_s28 + $0x54] ss:$8 sps:$4 sm:$0xff]  }
  0x50   : > { %749 = vmatpush1.bf16.msra.mxu1 %v1167_v3  ;;  %707 = vmatprep.subr.bf16.mxu0 %v1168_v4  ;;  %v1173_v7 = vld [vmem:[%s1604_s28 + $0x160] ss:$8 sps:$4 sm:$0xff]   ;;  %v1176_v9 = vld [vmem:[%s1604_s28 + $0x154] ss:$8 sps:$4 sm:$0xff]   ;;  %v1178_v10 = vld [vmem:[%s1604_s28 + $0x50] ss:$8 sps:$4 sm:$0xff]   ;;  %v808_v4 = vlaneseq }
  0x51   : > { %750 = vmatprep.subr.bf16.mxu1 %v1170_v5  ;;  %v1179_v11 = vld [vmem:[%s1604_s28 + $0x150] ss:$8 sps:$4 sm:$0xff]   ;;  %v1180_v12 = vld [vmem:[%s1604_s28 + $0x44] ss:$8 sps:$4 sm:$0xff]   ;;  %v1184_v14 = vld [vmem:[%s1604_s28 + $0x40] ss:$8 sps:$4 sm:$0xff]  }
  0x52   : > { %v1182_v13 = vld [vmem:[%s1604_s28 + $0x144] ss:$8 sps:$4 sm:$0xff]   ;;  %v1185_v15 = vld [vmem:[%s1604_s28 + $0x140] ss:$8 sps:$4 sm:$0xff]   ;;  %v1186_v16 = vld [vmem:[%s1604_s28 + $0x34] ss:$8 sps:$4 sm:$0xff]  }
  0x53   : > { %708 = vmatpush1.bf16.msra.mxu0 %v1172_v6  ;;  %v1188_v17 = vld [vmem:[%s1604_s28 + $0x134] ss:$8 sps:$4 sm:$0xff]   ;;  %v1190_v18 = vld [vmem:[%s1604_s28 + $0x30] ss:$8 sps:$4 sm:$0xff]   ;;  %v1192_v20 = vld [vmem:[%s1604_s28 + $0x24] ss:$8 sps:$4 sm:$0xff]  }
  0x54   : > { %751 = vmatpush1.bf16.msra.mxu1 %v1173_v7  ;;  %709 = vmatprep.subr.bf16.mxu0 %v1174_v8  ;;  %v1191_v19 = vld [vmem:[%s1604_s28 + $0x130] ss:$8 sps:$4 sm:$0xff]   ;;  %v1194_v21 = vld [vmem:[%s1604_s28 + $0x124] ss:$8 sps:$4 sm:$0xff]   ;;  %v1196_v22 = vld [vmem:[%s1604_s28 + $0x20] ss:$8 sps:$4 sm:$0xff]  }
  0x55   : > { %752 = vmatprep.subr.bf16.mxu1 %v1176_v9  ;;  %v1197_v23 = vld [vmem:[%s1604_s28 + $0x120] ss:$8 sps:$4 sm:$0xff]   ;;  %v1198_v24 = vld [vmem:[%s1604_s28 + $0x14] ss:$8 sps:$4 sm:$0xff]   ;;  %v1202_v26 = vld [vmem:[%s1604_s28 + $0x10] ss:$8 sps:$4 sm:$0xff]  }
  0x56   : > { %v1200_v25 = vld [vmem:[%s1604_s28 + $0x114] ss:$8 sps:$4 sm:$0xff]   ;;  %v1203_v27 = vld [vmem:[%s1604_s28 + $0x110] ss:$8 sps:$4 sm:$0xff]   ;;  %v1204_v28 = vld [vmem:[%s1604_s28 + $0x4] ss:$8 sps:$4 sm:$0xff]  }
  0x57   : > { %710 = vmatpush1.bf16.msra.mxu0 %v1178_v10  ;;  %v1206_v29 = vld [vmem:[%s1604_s28 + $0x104] ss:$8 sps:$4 sm:$0xff]   ;;  %v1208_v30 = vld [vmem:[%s1604_s28] ss:$8 sps:$4 sm:$0xff]   ;;  %v1210_v32 = vld [vmem:[%s1604_s28 + $0xf4] ss:$8 sps:$4 sm:$0xff]  }
  0x58   : > { %753 = vmatpush1.bf16.msra.mxu1 %v1179_v11  ;;  %711 = vmatprep.subr.bf16.mxu0 %v1180_v12  ;;  %v1209_v31 = vld [vmem:[%s1604_s28 + $0x100] ss:$8 sps:$4 sm:$0xff]   ;;  %v1212_v33 = vld [vmem:[%s1604_s28 + $0x1f4] ss:$8 sps:$4 sm:$0xff]   ;;  %v1214_v34 = vld [vmem:[%s1604_s28 + $0xf0] ss:$8 sps:$4 sm:$0xff]  }
  0x59   : > { %754 = vmatprep.subr.bf16.mxu1 %v1182_v13  ;;  %v1215_v35 = vld [vmem:[%s1604_s28 + $0x1f0] ss:$8 sps:$4 sm:$0xff]   ;;  %v1216_v36 = vld [vmem:[%s1604_s28 + $0xe4] ss:$8 sps:$4 sm:$0xff]   ;;  %v1220_v38 = vld [vmem:[%s1604_s28 + $0xe0] ss:$8 sps:$4 sm:$0xff]  }
  0x5a   : > { %v1218_v37 = vld [vmem:[%s1604_s28 + $0x1e4] ss:$8 sps:$4 sm:$0xff]   ;;  %v1221_v39 = vld [vmem:[%s1604_s28 + $0x1e0] ss:$8 sps:$4 sm:$0xff]   ;;  %v1222_v40 = vld [vmem:[%s1604_s28 + $0xd4] ss:$8 sps:$4 sm:$0xff]  }
  0x5b   : > { %712 = vmatpush1.bf16.msra.mxu0 %v1184_v14  ;;  %v1224_v41 = vld [vmem:[%s1604_s28 + $0x1d4] ss:$8 sps:$4 sm:$0xff]   ;;  %v1226_v42 = vld [vmem:[%s1604_s28 + $0xd0] ss:$8 sps:$4 sm:$0xff]   ;;  %v1228_v44 = vld [vmem:[%s1604_s28 + $0xc4] ss:$8 sps:$4 sm:$0xff]  }
  0x5c   : > { %755 = vmatpush1.bf16.msra.mxu1 %v1185_v15  ;;  %713 = vmatprep.subr.bf16.mxu0 %v1186_v16  ;;  %v1227_v43 = vld [vmem:[%s1604_s28 + $0x1d0] ss:$8 sps:$4 sm:$0xff]   ;;  %v1230_v45 = vld [vmem:[%s1604_s28 + $0x1c4] ss:$8 sps:$4 sm:$0xff]   ;;  %v1232_v46 = vld [vmem:[%s1604_s28 + $0xc0] ss:$8 sps:$4 sm:$0xff]  }
  0x5d   : > { %756 = vmatprep.subr.bf16.mxu1 %v1188_v17  ;;  %v1260_v47 = vld [vmem:[#allocation3 + $0x4] ss:$16 sps:$4 sm:$0xff]   ;;  %v1233_v48 = vld [vmem:[%s1604_s28 + $0x1c0] ss:$8 sps:$4 sm:$0xff]   ;;  %v1263_v51 = vld [vmem:[#allocation3 + $0xc] ss:$16 sps:$4 sm:$0xff]  }
  0x5e   : > { %v1234_v49 = vld [vmem:[%s1604_s28 + $0xb4] ss:$8 sps:$4 sm:$0xff]   ;;  %737 = vmatprep.mubr.bf16.mxu0 %v1260_v47  ;;  %780 = vmatprep.mubr.bf16.mxu1 %v1263_v51  ;;  %v1238_v52 = vld [vmem:[%s1604_s28 + $0xb0] ss:$8 sps:$4 sm:$0xff]   ;;  %v1240_v54 = vld [vmem:[%s1604_s28 + $0xa4] ss:$8 sps:$4 sm:$0xff]  }
  0x5f   : > { %714 = vmatpush1.bf16.msra.mxu0 %v1190_v18  ;;  %v1236_v50 = vld [vmem:[%s1604_s28 + $0x1b4] ss:$8 sps:$4 sm:$0xff]   ;;  %v1239_v53 = vld [vmem:[%s1604_s28 + $0x1b0] ss:$8 sps:$4 sm:$0xff]   ;;  %v1242_v55 = vld [vmem:[%s1604_s28 + $0x1a4] ss:$8 sps:$4 sm:$0xff]  }
  0x60   : > { %757 = vmatpush1.bf16.msra.mxu1 %v1191_v19  ;;  %715 = vmatprep.subr.bf16.mxu0 %v1192_v20  ;;  %v1244_v56 = vld [vmem:[%s1604_s28 + $0xa0] ss:$8 sps:$4 sm:$0xff]   ;;  %v1246_v58 = vld [vmem:[%s1604_s28 + $0x94] ss:$8 sps:$4 sm:$0xff]   ;;  %v1250_v60 = vld [vmem:[%s1604_s28 + $0x90] ss:$8 sps:$4 sm:$0xff]  }
  0x61   : > { %758 = vmatprep.subr.bf16.mxu1 %v1194_v21  ;;  %v1245_v57 = vld [vmem:[%s1604_s28 + $0x1a0] ss:$8 sps:$4 sm:$0xff]   ;;  %v1248_v59 = vld [vmem:[%s1604_s28 + $0x194] ss:$8 sps:$4 sm:$0xff]   ;;  %v1251_v61 = vld [vmem:[%s1604_s28 + $0x190] ss:$8 sps:$4 sm:$0xff]  }
  0x62   : > { %v1252_v62 = vld [vmem:[%s1604_s28 + $0x84] ss:$8 sps:$4 sm:$0xff]   ;;  %v1256_v0 = vld [vmem:[%s1604_s28 + $0x80] ss:$8 sps:$4 sm:$0xff]   ;;  %v809_v5 = vshrl.u32 %v808_v4, 7  ;;  %s250_s20 = scalar_lea.vmem [#allocation8], %s994_s5 }
  0x63   : > { %716 = vmatpush1.bf16.msra.mxu0 %v1196_v22  ;;  %v1254_v63 = vld [vmem:[%s1604_s28 + $0x184] ss:$8 sps:$4 sm:$0xff]   ;;  %v1257_v1 = vld [vmem:[%s1604_s28 + $0x180] ss:$8 sps:$4 sm:$0xff]   ;;  %s995_s23 = sshll.u32 %s1601_s7, 4  ;;  %s1075_s19 = sshll.u32 %s1422_s15, 7 }
  0x64   : > { %759 = vmatpush1.bf16.msra.mxu1 %v1197_v23  ;;  %717 = vmatprep.subr.bf16.mxu0 %v1198_v24  ;;  %v1258_v2 = vld [vmem:[#allocation3] ss:$16 sps:$4 sm:$0xff]   ;;  %v1261_v3 = vld [vmem:[#allocation3 + $0x8] ss:$16 sps:$4 sm:$0xff]   ;;  %v810_v6 = vsub.s32 0, %v809_v5  ;;  %v814_v7 = vsub.s32 1, %v809_v5  ;;  %s1682_s8 = scalar_lea.hbm %s1732_s3, %s1075_s19 }
  0x65   : > { %760 = vmatprep.subr.bf16.mxu1 %v1200_v25  ;;  %v806_v8 = vld [vmem:[%s250_s20] sm:$0x3]  ;;  %s277_s27 = scalar_lea.vmem [#allocation9], %s995_s23  ;;  %s837_s9 = scalar_lea.sflag [#allocation5], %s1601_s7 }
  0x66   : > { %v811_v12 = vrot.slane %v806_v8, %v810_v6  ;;  %v815_v13 = vrot.slane %v806_v8, %v814_v7  ;;  %s853_s10 = sshll.u32 %s277_s27, 4  ;;  %p1745_p8 = scmp.ne.s32.totalorder %s1738_s25, 0  ;;  %s1677_s10 = int_to_ptr.vmem [resolvable:$true] %s853_s10 }
  0x67   : > { %718 = vmatpush1.bf16.msra.mxu0 %v1202_v26  ;;  %s1346_s11 = scalar_lea.vmem %s1677_s10, 256  ;;  %s1440_s15 = smov [#allocation9]  }
  0x68   : > { %761 = vmatpush1.bf16.msra.mxu1 %v1203_v27  ;;  %719 = vmatprep.subr.bf16.mxu0 %v1204_v28  ;;  %p1347_p6 = scmp.ne.s32.totalorder %s1677_s10, %s1346_s11  ;;  %s1350_s21 = sshll.u32 %s1440_s15, 4  ;;  %s1351_s21 = int_to_ptr.vmem [resolvable:$false] %s1350_s21 }
  0x69   : > { %762 = vmatprep.subr.bf16.mxu1 %v1206_v29  ;;  %s1352_s30 = scalar_lea.vmem %s1351_s21, 512  ;;  %p1353_p12 = scmp.lt.s32.totalorder %s1677_s10, %s1351_s21 }
  0x6a   : > { %p1348_p13 = pnand %p1347_p6, %p1745_p8  ;;  %p1354_p0 = scmp.lt.s32.totalorder %s1352_s30, %s1346_s11 }
  0x6b   : > { %720 = vmatpush1.bf16.msra.mxu0 %v1208_v30 }
  0x6c   : > { %763 = vmatpush1.bf16.msra.mxu1 %v1209_v31  ;;  %721 = vmatprep.subr.bf16.mxu0 %v1210_v32  ;;  %p1349_p1 = pneg %p1348_p13  ;;  %p1355_p2 = por %p1354_p0, %p1353_p12 }
  0x6d   : > { %764 = vmatprep.subr.bf16.mxu1 %v1212_v33 }
  0x6e   : > { %p1356_p4 = pnand %p1355_p2, %p1349_p1 }
  0x6f   : > { %722 = vmatpush2.bf16.msra.mxu0 %v1214_v34 }
  0x70   : > { %765 = vmatpush2.bf16.msra.mxu1 %v1215_v35  ;;  %723 = vmatprep.subr.bf16.mxu0 %v1216_v36 }
  0x71   : > { %766 = vmatprep.subr.bf16.mxu1 %v1218_v37 }
  0x73   : > { %724 = vmatpush2.bf16.msra.mxu0 %v1220_v38 }
  0x74   : > { %767 = vmatpush2.bf16.msra.mxu1 %v1221_v39  ;;  %725 = vmatprep.subr.bf16.mxu0 %v1222_v40 }
  0x75   : > { %768 = vmatprep.subr.bf16.mxu1 %v1224_v41 }
  0x77   : > { %726 = vmatpush2.bf16.msra.mxu0 %v1226_v42 }
  0x78   : > { %769 = vmatpush2.bf16.msra.mxu1 %v1227_v43  ;;  %727 = vmatprep.subr.bf16.mxu0 %v1228_v44 }
  0x79   : > { %770 = vmatprep.subr.bf16.mxu1 %v1230_v45 }
  0x7b   : > { %728 = vmatpush2.bf16.msra.mxu0 %v1232_v46 }
  0x7c   : > { %771 = vmatpush2.bf16.msra.mxu1 %v1233_v48  ;;  %729 = vmatprep.subr.bf16.mxu0 %v1234_v49 }
  0x7d   : > { %772 = vmatprep.subr.bf16.mxu1 %v1236_v50 }
  0x7f   : > { %730 = vmatpush2.bf16.msra.mxu0 %v1238_v52 }
  0x80   : > { %773 = vmatpush2.bf16.msra.mxu1 %v1239_v53  ;;  %731 = vmatprep.subr.bf16.mxu0 %v1240_v54 }
  0x81   : > { %774 = vmatprep.subr.bf16.mxu1 %v1242_v55 }
  0x83   : > { %732 = vmatpush2.bf16.msra.mxu0 %v1244_v56 }
  0x84   : > { %775 = vmatpush2.bf16.msra.mxu1 %v1245_v57  ;;  %733 = vmatprep.subr.bf16.mxu0 %v1246_v58 }
  0x85   : > { %776 = vmatprep.subr.bf16.mxu1 %v1248_v59 }
  0x87   : > { %734 = vmatpush2.bf16.msra.mxu0 %v1250_v60 }
  0x88   : > { %777 = vmatpush2.bf16.msra.mxu1 %v1251_v61  ;;  %735 = vmatprep.subr.bf16.mxu0 %v1252_v62 }
  0x89   : > { %778 = vmatprep.subr.bf16.mxu1 %v1254_v63 }
  0x8b   : > { %736 = vmatpush2.bf16.msra.mxu0 %v1256_v0 }
  0x8c   : > { %779 = vmatpush2.bf16.msra.mxu1 %v1257_v1 }
  0x8e   : > { %738 = vmatmul.mubr.bf16.vlgmr.msra.gmra.mxu0 %v1258_v2 }
  0x8f   : > { %781 = vmatmul.mubr.bf16.vlgmr.msra.gmra.mxu1 %v1261_v3 }
 0x14e   : > { %v739_v9 = vpop.f32.mrf.mxu0 }
 0x14f   : > { %v782_v10 = vpop.f32.mrf.mxu1 }
 0x150   : > { %v783_v11 = vadd.f32 %v782_v10, %v739_v9  ;;  %v741_v14 = vpop.f32.mrf.mxu0 }
 0x151   : > { %v784_v15 = vpop.f32.mrf.mxu1 }
 0x152   : > { %v785_v16 = vadd.f32 %v784_v15, %v741_v14  ;;  %v743_v17 = vpop.f32.mrf.mxu0  ;;  %v818_v19 = vadd.f32 %v811_v12, %v783_v11 }
 0x153   : > { %v786_v18 = vpop.f32.mrf.mxu1 }
 0x154   : > { %v819_v20 = vadd.f32 %v815_v13, %v785_v16  ;;  %v787_v21 = vadd.f32 %v786_v18, %v743_v17  ;;  %v745_v22 = vpop.f32.mrf.mxu0 }
 0x155   : > { %v788_v23 = vpop.f32.mrf.mxu1 }
 0x156   : > { %v1073_v24 = vpack.c.bf16 %v819_v20, %v818_v19  ;;  %v789_v25 = vadd.f32 %v788_v23, %v745_v22  ;;  %v820_v26 = vadd.f32 %v811_v12, %v787_v21 }
 0x158   : > { %834 = vst [vmem:[%s277_s27] sm:$0xff] %v1073_v24  ;;  %v821_v27 = vadd.f32 %v815_v13, %v789_v25 }
 0x15a   : > { %v1074_v28 = vpack.c.bf16 %v821_v27, %v820_v26 }
 0x15c   : > { %835 = vst [vmem:[%s277_s27 + $0x8] sm:$0xff] %v1074_v28 }
 0x15d   : > { %1359 = shalt.err (!%p1356_p4)
}
 0x15e   : > { %s1360_s29 = scalar_lea.hbm %s1682_s8, 256  ;;  %s1364_s5 = scalar_lea.hbm %s1732_s3, 1024 }
 0x15f   : > { %p1361_p7 = scmp.ne.s32.totalorder %s1682_s8, %s1360_s29  ;;  %p1365_p9 = scmp.lt.s32.totalorder %s1682_s8, %s1732_s3 }
 0x160   : > { %p1366_p10 = scmp.lt.s32.totalorder %s1364_s5, %s1360_s29 }
 0x161   : > { %p1362_p3 = pnand %p1361_p7, %p1745_p8 }
 0x162   : > { %p1367_p11 = por %p1366_p10, %p1365_p9 }
 0x163   : > { %p1363_p5 = pneg %p1362_p3 }
 0x165   : > { %p1368_p6 = pnand %p1367_p11, %p1363_p5 }
 0x167   : > { %1371 = shalt.err (!%p1368_p6)
}
 0x168   : > { %s1441_s27 = smov 128   ;;  %s1442_s19 = smov 512  }
 0x169   : > { %s1443_s6 = smov 8  }
 0x16a   : > { %1084 = dma.vmem_to_hbm [thread:$0]  (%p1745_p8), %s1677_s10, 256, %s1682_s8, %s837_s9, %s1441_s27, %s1442_s19, %s1443_s6  }
 0x16b PF: > { %p1104_p13 = scmp.ge.s32.totalorder %s1430_s17, 2  ;;  %s868_s4 = sand.u32 1, %s1410_s12  }
 0x16c   : > { %p1746_p1 = scmp.ne.s32.totalorder %s1739_s26, 0  ;;  %s869_s11 = scalar_lea.sflag [#allocation5], %s868_s4 }
 0x16e   : > { %p1098_p12 = pnand %p1104_p13, %p1746_p1 }
 0x170   : > { %p1099_p0 = pneg %p1098_p12 }
 0x172   : > { %1405 = dma.done.wait (%p1099_p0), %s869_s11, 256  }
 0x173   : > { %1407 = vsyncadd (%p1099_p0), %s869_s11, 4294967040  ;;  %s20_s17 = sadd.s32 1, %s1430_s17   ;;  %s1747_s12 = smov %s1414_s13 }
 0x174   : > { %p17_p2 = scmp.ge.s32.totalorder %s20_s17, 6   ;;  %s1748_s13 = smov %s1418_s14 }
 0x175   : > { %s1749_s14 = smov %s1511_s24  ;;  %s1750_s15 = smov %s1426_s16 }
 0x176   : > { %s1751_s16 = smov %s1753_s18  ;;  %19 = sbr.rel (!%p17_p2) target bundleno = 7 (0x7), region = 102 }
 0x17b   :  { %874 = vsyncpa [#allocation4], 1 }
 0x17c   :  { %876 = vsyncpa [#allocation4 + $0x1], 1 }
 0x17d   :  { %877 = vsyncpa [#allocation7], 1 }
 0x17e   :  { %879 = vsyncpa [#allocation7 + $0x1], 1 }
 0x17f   :  { %880 = vsyncpa [#allocation5], 1 }
 0x180   :  { %882 = vsyncpa [#allocation5 + $0x1], 1 }

</bundles_post_ra>
